<compile_context>
chip_gen: v5e
topology: v5e:2x2
jax: 0.10.0
libtpu: 0.0.40
codegen_flags: <defaults>
</compile_context>

<pallas_src>
import functools

import jax
import jax.numpy as jnp
from jax.experimental import pallas as pl
from jax.experimental.pallas import tpu as pltpu


# ---------------------------------------------------------------------------
# Fused single-pass kernel: pool + MLP + rescale, one batch row per grid step.
# ---------------------------------------------------------------------------
def se_fused_kernel(x_ref, w1t_ref, b1_ref, w2t_ref, b2_ref, o_ref, *, inv_hw):
    x = x_ref[...].astype(jnp.float32)                                   # (1, C, HW)
    s = jnp.sum(x, axis=2) * inv_hw                                      # (1, C)
    z1 = jnp.dot(s, w1t_ref[...],
                 preferred_element_type=jnp.float32) + b1_ref[...]       # (1, Cr)
    z1 = jnp.maximum(z1, 0.0)                                            # ReLU
    z2 = jnp.dot(z1, w2t_ref[...],
                 preferred_element_type=jnp.float32) + b2_ref[...]       # (1, C)
    gate = jax.nn.sigmoid(z2)                                            # (1, C)
    o_ref[...] = (x * gate[:, :, None]).astype(o_ref.dtype)


# ---------------------------------------------------------------------------
# Two-pass fallback, Pass A: squeeze (global avg pool) + excitation -> gate.
# ---------------------------------------------------------------------------
def squeeze_excite_kernel(x_ref, w1t_ref, b1_ref, w2t_ref, b2_ref,
                          gate_ref, acc_ref, *, inv_hw):
    j = pl.program_id(1)

    @pl.when(j == 0)
    def _init():
        acc_ref[...] = jnp.zeros_like(acc_ref)

    # Hot loop: pure VALU elementwise accumulate (per-lane partial sums);
    # the XLU cross-lane reduction is hoisted into the once-per-row finalize.
    acc_ref[...] += x_ref[...].astype(jnp.float32)

    @pl.when(j == pl.num_programs(1) - 1)
    def _finalize():
        s = jnp.sum(acc_ref[...], axis=2) * inv_hw                       # (1, C)
        z1 = jnp.dot(s, w1t_ref[...],
                     preferred_element_type=jnp.float32) + b1_ref[...]   # (1, Cr)
        z1 = jnp.maximum(z1, 0.0)                                        # ReLU
        z2 = jnp.dot(z1, w2t_ref[...],
                     preferred_element_type=jnp.float32) + b2_ref[...]   # (1, C)
        gate = jax.nn.sigmoid(z2)
        gate_ref[...] = gate[:, :, None].astype(gate_ref.dtype)          # (1, C, 1)


# ---------------------------------------------------------------------------
# Two-pass fallback, Pass B: channel-wise rescale (mem-bound hot path).
# ---------------------------------------------------------------------------
def scale_kernel(x_ref, gate_ref, o_ref):
    x = x_ref[...].astype(jnp.float32)          # (1, C, hw_tile)
    g = gate_ref[...].astype(jnp.float32)       # (1, C, 1) -> broadcast on lanes
    o_ref[...] = (x * g).astype(o_ref.dtype)


# ---------------------------------------------------------------------------
# Wrapper
# ---------------------------------------------------------------------------
_FUSED_VMEM_BUDGET = 24 * 1024 * 1024   # conservative: fits v7x's 64 MiB VMEM


def _fits_fused(c, hw, itemsize):
    row_io = c * hw * itemsize
    row_f32 = c * hw * 4
    # double-buffered in + double-buffered out + f32 temporaries
    return (4 * row_io + 2 * row_f32) <= _FUSED_VMEM_BUDGET


def _pick_hw_tile(hw, c, target_block_bytes=2 << 20, max_lanes=4096):
    """Largest multiple of 128 that divides hw and keeps a (1, C, hw_tile) f32
    block around ~2 MiB (safe double-buffered on v5e/v6e/v7x VMEM)."""
    if hw % 128 != 0:
        return hw  # must use the full extent if not lane-aligned
    lane_budget = max(128, (target_block_bytes // (4 * max(c, 1))) // 128 * 128)
    t = min(hw, lane_budget, max_lanes)
    t -= t % 128
    while t > 128 and hw % t != 0:
        t -= 128
    return t if (t >= 128 and hw % t == 0) else hw


def se_block_forward(x_nchw, params, *, hw_tile=None, force_two_pass=False):
    """x_nchw: (N, C, H, W). Returns gate * x with the same shape/dtype."""
    n, c, h, w = x_nchw.shape
    hw = h * w
    x3 = x_nchw.reshape(n, c, hw)

    # 1x1 convs == linear layers over channels; PyTorch stores (out, in).
    # Pre-transpose in the wrapper so the kernel does row-major matmuls.
    w1t = params["w1"].T.astype(jnp.float32)        # (C, Cr)
    w2t = params["w2"].T.astype(jnp.float32)        # (Cr, C)
    b1 = params["b1"].reshape(1, -1).astype(jnp.float32)
    b2 = params["b2"].reshape(1, -1).astype(jnp.float32)
    cr = w1t.shape[1]
    itemsize = jnp.dtype(x_nchw.dtype).itemsize

    weight_specs = [
        pl.BlockSpec((c, cr), lambda i, *_: (0, 0)),
        pl.BlockSpec((1, cr), lambda i, *_: (0, 0)),
        pl.BlockSpec((cr, c), lambda i, *_: (0, 0)),
        pl.BlockSpec((1, c), lambda i, *_: (0, 0)),
    ]

    # ---- Fused single-pass path: one full (1, C, HW) row per grid step ----
    if not force_two_pass and _fits_fused(c, hw, itemsize):
        scaled = pl.pallas_call(
            functools.partial(se_fused_kernel, inv_hw=1.0 / hw),
            grid=(n,),
            in_specs=[pl.BlockSpec((1, c, hw), lambda i: (i, 0, 0))] + weight_specs,
            out_specs=pl.BlockSpec((1, c, hw), lambda i: (i, 0, 0)),
            out_shape=jax.ShapeDtypeStruct((n, c, hw), x_nchw.dtype),
            compiler_params=pltpu.CompilerParams(
                dimension_semantics=("parallel",),
                vmem_limit_bytes=48 * 1024 * 1024),
            cost_estimate=pl.CostEstimate(
                flops=int(2 * n * c * hw + 2 * n * (c * cr + cr * c)),
                transcendentals=int(n * c),
                bytes_accessed=int(itemsize * 2 * n * c * hw
                                   + 4 * (c * cr + cr * c + c + cr))),
        )(x3, w1t, b1, w2t, b2)
        return scaled.reshape(n, c, h, w)

    # ---- Two-pass fallback ------------------------------------------------
    if hw_tile is None:
        hw_tile = _pick_hw_tile(hw, c)
    assert hw % hw_tile == 0, (hw, hw_tile)
    num_hw_tiles = hw // hw_tile

    vmem_limit = 32 * 1024 * 1024

    # Pass A: squeeze + excitation -> gate (N, C, 1)
    gate3 = pl.pallas_call(
        functools.partial(squeeze_excite_kernel, inv_hw=1.0 / hw),
        grid=(n, num_hw_tiles),
        in_specs=[pl.BlockSpec((1, c, hw_tile), lambda i, j: (i, 0, j))]
                 + weight_specs,
        out_specs=pl.BlockSpec((1, c, 1), lambda i, j: (i, 0, 0)),
        out_shape=jax.ShapeDtypeStruct((n, c, 1), jnp.float32),
        scratch_shapes=[pltpu.VMEM((1, c, hw_tile), jnp.float32)],
        compiler_params=pltpu.CompilerParams(
            dimension_semantics=("parallel", "arbitrary"),
            vmem_limit_bytes=vmem_limit),
        cost_estimate=pl.CostEstimate(
            flops=int(n * c * hw + 2 * n * (c * cr + cr * c)),
            transcendentals=int(n * c),
            bytes_accessed=int(itemsize * n * c * hw
                               + 4 * (n * c + c * cr + cr * c + c + cr))),
    )(x3, w1t, b1, w2t, b2)

    # Pass B: channel-wise rescale (streaming, lane-dense output)
    scaled = pl.pallas_call(
        scale_kernel,
        grid=(n, num_hw_tiles),
        in_specs=[
            pl.BlockSpec((1, c, hw_tile), lambda i, j: (i, 0, j)),
            pl.BlockSpec((1, c, 1), lambda i, j: (i, 0, 0)),
        ],
        out_specs=pl.BlockSpec((1, c, hw_tile), lambda i, j: (i, 0, j)),
        out_shape=jax.ShapeDtypeStruct((n, c, hw), x_nchw.dtype),
        compiler_params=pltpu.CompilerParams(
            dimension_semantics=("parallel", "parallel"),
            vmem_limit_bytes=vmem_limit),
        cost_estimate=pl.CostEstimate(
            flops=int(n * c * hw),
            transcendentals=0,
            bytes_accessed=int(itemsize * 2 * n * c * hw + 4 * n * c)),
    )(x3, gate3)

    return scaled.reshape(n, c, h, w)


# ---------------------------------------------------------------------------
# Params / reference / demo
# ---------------------------------------------------------------------------
def make_params(key, in_channels, mid_channels):
    k1, k2, k3, k4 = jax.random.split(key, 4)
    scale = 0.1
    return {
        "w1": scale * jax.random.normal(k1, (mid_channels, in_channels), jnp.float32),
        "b1": scale * jax.random.normal(k2, (mid_channels,), jnp.float32),
        "w2": scale * jax.random.normal(k3, (in_channels, mid_channels), jnp.float32),
        "b2": scale * jax.random.normal(k4, (in_channels,), jnp.float32),
    }


def se_block_reference(x_nchw, params):
    """Pure-JAX reference matching the PyTorch SEBlock.forward."""
    s = jnp.mean(x_nchw, axis=(2, 3))                                 # (N, C)
    z1 = jnp.maximum(s @ params["w1"].T + params["b1"], 0.0)
    gate = jax.nn.sigmoid(z1 @ params["w2"].T + params["b2"])         # (N, C)
    return x_nchw * gate[:, :, None, None]


if __name__ == "__main__":
    key = jax.random.PRNGKey(0)
    kx, kp = jax.random.split(key)

    N, C, MID, H, W = 2, 32, 8, 32, 32
    x = jax.random.normal(kx, (N, C, H, W), jnp.float32)
    params = make_params(kp, C, MID)
    ref = se_block_reference(x, params)

    # Fused single-pass path (row fits in VMEM at this size).
    out_fused = jax.block_until_ready(se_block_forward(x, params))
    assert out_fused.shape == ref.shape
    assert jnp.allclose(out_fused, ref, atol=1e-5, rtol=1e-5), "fused mismatch"

    # Two-pass fallback: hw_tile=256 -> 4 HW tiles per row, exercising the
    # accumulate/init/finalize reduction and the double-buffered scale pass.
    out_2p = jax.block_until_ready(
        se_block_forward(x, params, hw_tile=256, force_two_pass=True))
    assert out_2p.shape == ref.shape
    assert jnp.allclose(out_2p, ref, atol=1e-5, rtol=1e-5), "two-pass mismatch"

    print("KERNEL_OK")
</pallas_src>

<mosaic_0001>
module attributes {stable_mosaic.version = 11 : i64} {
  func.func @se_fused_kernel(%arg0: i32, %arg1: memref<1x32x1024xf32, #tpu.memory_space<vmem>>, %arg2: memref<32x8xf32, #tpu.memory_space<vmem>>, %arg3: memref<1x8xf32, #tpu.memory_space<vmem>>, %arg4: memref<8x32xf32, #tpu.memory_space<vmem>>, %arg5: memref<1x32xf32, #tpu.memory_space<vmem>>, %arg6: memref<1x32x1024xf32, #tpu.memory_space<vmem>>) attributes {dimension_semantics = [#tpu.dimension_semantics<parallel>], iteration_bounds = array<i64: 2>, scalar_prefetch = 0 : i64, scratch_operands = 0 : i64, tpu.core_type = #tpu.core_type<tc>, window_params = [{transform_indices = @transform_0, window_bounds = array<i64: 1, 32, 1024>}, {pipeline_mode = #tpu.pipeline_mode<synchronous>, transform_indices = @transform_1, window_bounds = array<i64: 32, 8>}, {pipeline_mode = #tpu.pipeline_mode<synchronous>, transform_indices = @transform_2, window_bounds = array<i64: 1, 8>}, {pipeline_mode = #tpu.pipeline_mode<synchronous>, transform_indices = @transform_3, window_bounds = array<i64: 8, 32>}, {pipeline_mode = #tpu.pipeline_mode<synchronous>, transform_indices = @transform_4, window_bounds = array<i64: 1, 32>}, {transform_indices = @transform_5, window_bounds = array<i64: 1, 32, 1024>}]} {
    %c0 = arith.constant 0 : index
    %c0_0 = arith.constant 0 : index
    %c0_1 = arith.constant 0 : index
    %0 = vector.load %arg1[%c0, %c0_0, %c0_1] : memref<1x32x1024xf32, #tpu.memory_space<vmem>>, vector<1x32x1024xf32>
    %cst = arith.constant dense<0.000000e+00> : vector<1x32xf32>
    %1 = vector.multi_reduction <add>, %0, %cst [2] : vector<1x32x1024xf32> to vector<1x32xf32>
    %cst_2 = arith.constant 9.765625E-4 : f32
    %2 = vector.broadcast %cst_2 : f32 to vector<1x32xf32>
    %3 = arith.mulf %1, %2 : vector<1x32xf32>
    %c0_3 = arith.constant 0 : index
    %c0_4 = arith.constant 0 : index
    %4 = vector.load %arg2[%c0_3, %c0_4] : memref<32x8xf32, #tpu.memory_space<vmem>>, vector<32x8xf32>
    %cst_5 = arith.constant dense<0.000000e+00> : vector<1x8xf32>
    %5 = tpu.matmul %3, %4, %cst_5 {dimension_numbers = #tpu.dot_dimension_numbers<[1], [0], [0], [1], [0, 0, 1, 1], [], []>} : vector<1x32xf32>, vector<32x8xf32>, vector<1x8xf32> -> vector<1x8xf32>
    %c0_6 = arith.constant 0 : index
    %c0_7 = arith.constant 0 : index
    %6 = vector.load %arg3[%c0_6, %c0_7] : memref<1x8xf32, #tpu.memory_space<vmem>>, vector<1x8xf32>
    %7 = arith.addf %5, %6 : vector<1x8xf32>
    %cst_8 = arith.constant 0.000000e+00 : f32
    %8 = vector.broadcast %cst_8 : f32 to vector<1x8xf32>
    %9 = arith.maximumf %7, %8 : vector<1x8xf32>
    %c0_9 = arith.constant 0 : index
    %c0_10 = arith.constant 0 : index
    %10 = vector.load %arg4[%c0_9, %c0_10] : memref<8x32xf32, #tpu.memory_space<vmem>>, vector<8x32xf32>
    %cst_11 = arith.constant dense<0.000000e+00> : vector<1x32xf32>
    %11 = tpu.matmul %9, %10, %cst_11 {dimension_numbers = #tpu.dot_dimension_numbers<[1], [0], [0], [1], [0, 0, 1, 1], [], []>} : vector<1x8xf32>, vector<8x32xf32>, vector<1x32xf32> -> vector<1x32xf32>
    %c0_12 = arith.constant 0 : index
    %c0_13 = arith.constant 0 : index
    %12 = vector.load %arg5[%c0_12, %c0_13] : memref<1x32xf32, #tpu.memory_space<vmem>>, vector<1x32xf32>
    %13 = arith.addf %11, %12 : vector<1x32xf32>
    %14 = arith.negf %13 : vector<1x32xf32>
    %15 = math.exp %14 : vector<1x32xf32>
    %cst_14 = arith.constant 1.000000e+00 : f32
    %16 = vector.broadcast %cst_14 : f32 to vector<1x32xf32>
    %17 = arith.addf %16, %15 : vector<1x32xf32>
    %18 = arith.divf %16, %17 : vector<1x32xf32>
    %19 = vector.shape_cast %18 : vector<1x32xf32> to vector<1x32x1xf32>
    %20 = vector.broadcast %19 : vector<1x32x1xf32> to vector<1x32x1024xf32>
    %21 = arith.mulf %0, %20 : vector<1x32x1024xf32>
    %c0_15 = arith.constant 0 : index
    %c0_16 = arith.constant 0 : index
    %c0_17 = arith.constant 0 : index
    %22 = vector.load %arg6[%c0_15, %c0_16, %c0_17] : memref<1x32x1024xf32, #tpu.memory_space<vmem>>, vector<1x32x1024xf32>
    tpu.vector_store %arg6[%c0_15, %c0_16, %c0_17], %21 {strides = array<i32>} : memref<1x32x1024xf32, #tpu.memory_space<vmem>>, vector<1x32x1024xf32>,
    return
  }
  func.func @transform_0(%arg0: i32) -> (i32, i32, i32) {
    %c0_i32 = arith.constant 0 : i32
    %c0_i32_0 = arith.constant 0 : i32
    %c0_i32_1 = arith.constant 0 : i32
    return %arg0, %c0_i32, %c0_i32_0 : i32, i32, i32
  }
  func.func @transform_1(%arg0: i32) -> (i32, i32) {
    %c0_i32 = arith.constant 0 : i32
    %c0_i32_0 = arith.constant 0 : i32
    %c0_i32_1 = arith.constant 0 : i32
    return %c0_i32, %c0_i32_0 : i32, i32
  }
  func.func @transform_2(%arg0: i32) -> (i32, i32) {
    %c0_i32 = arith.constant 0 : i32
    %c0_i32_0 = arith.constant 0 : i32
    %c0_i32_1 = arith.constant 0 : i32
    return %c0_i32, %c0_i32_0 : i32, i32
  }
  func.func @transform_3(%arg0: i32) -> (i32, i32) {
    %c0_i32 = arith.constant 0 : i32
    %c0_i32_0 = arith.constant 0 : i32
    %c0_i32_1 = arith.constant 0 : i32
    return %c0_i32, %c0_i32_0 : i32, i32
  }
  func.func @transform_4(%arg0: i32) -> (i32, i32) {
    %c0_i32 = arith.constant 0 : i32
    %c0_i32_0 = arith.constant 0 : i32
    %c0_i32_1 = arith.constant 0 : i32
    return %c0_i32, %c0_i32_0 : i32, i32
  }
  func.func @transform_5(%arg0: i32) -> (i32, i32, i32) {
    %c0_i32 = arith.constant 0 : i32
    %c0_i32_0 = arith.constant 0 : i32
    %c0_i32_1 = arith.constant 0 : i32
    return %arg0, %c0_i32, %c0_i32_0 : i32, i32, i32
  }
}

</mosaic_0001>

<bundles_post_ra>
// kernel: tpu_custom_call.1
= control target key start
LH: loop header
LB: loop body
LE: loop exit
PB: predicated region body
PF: predicated region fallthrough
CT: control target
= control target key end

     0   :  { %10 = vsyncpa [#allocation3], 0  ;;  %s1147_s0 = inlined_call_operand.hbm [shape: f32[2,32,1024], index: 0, kind: input, shape index: {}]   ;;  %s1148_s1 = inlined_call_operand.vmem [shape: f32[32,8], index: 1, kind: input, shape index: {}]   ;;  %s1149_s2 = inlined_call_operand.vmem [shape: f32[1,8], index: 2, kind: input, shape index: {}]   ;;  %s1150_s3 = inlined_call_operand.vmem [shape: f32[8,32], index: 3, kind: input, shape index: {}]   ;;  %s1151_s4 = inlined_call_operand.vmem [shape: f32[1,32], index: 4, kind: input, shape index: {}]   ;;  %s1152_s5 = inlined_call_operand.hbm [shape: f32[2,32,1024], index: 5, kind: output, shape index: {}]  }
   0x1   :  { %12 = vsyncpa [#allocation3 + $0x1], 0 }
   0x2   :  { %13 = vsyncpa [#allocation4], 0 }
   0x3   :  { %15 = vsyncpa [#allocation4 + $0x1], 0  ;;  %s798_s18 = smov 0   ;;  %s800_s19 = smov 0  }
   0x4   :  { %s802_s20 = smov 0   ;;  %s804_s21 = smov 0  }
   0x5 LB: > { %s819_s22 = sadd.s32 4294967295, %s762_s21   ;;  %s588_s23 = sadd.s32 4294967294, %s762_s21   ;;  %s762_s21 = sphi %s804_s21, %s1162_s21   ;;  %s758_s20 = sphi %s802_s20, %s1161_s20   ;;  %s754_s19 = sphi %s800_s19, %s1160_s19   ;;  %s750_s18 = sphi %s798_s18, %s1159_s18  }
   0x6   : > { %s823_s24 = sadd.s32 1, %s762_s21   ;;  %s28_s25 = sadd.s32 1, %s758_s20 }
   0x7   : > { %s25_s26 = ssub.s32 %s762_s21, %s823_s24  ;;  %p35_p0 = scmp.ne.s32.totalorder %s758_s20, %s754_s19 }
   0x8   : > { %p26_p1 = scmp.eq.s32.totalorder %s25_s26, 0  ;;  %p36_p2 = scmp.eq.s32.totalorder %s762_s21, 0 }
   0x9   : > { %p41_p3 = scmp.ne.s32.totalorder %s754_s19, %s750_s18  ;;  %p42_p4 = scmp.eq.s32.totalorder %s819_s22, 0 }
   0xa   : > { %s835_s27 = scalar_select %p26_p1, %s758_s20, %s28_s25  }
   0xb   : > { %p837_p5 = por %p36_p2, %p35_p0  ;;  %p841_p6 = por %p42_p4, %p41_p3 }
   0xc   : > { %p149_p7 = scmp.eq.s32.totalorder %s819_s22, 1  ;;  %p155_p8 = scmp.eq.s32.totalorder %s588_s23, 1 }
   0xd   : > { %p619_p10 = scmp.lt.s32.totalorder %s762_s21, 2  ;;  %s187_s7 = sand.u32 1, %s758_s20  }
   0xe   : > { %p848_p11 = por %p149_p7, %p35_p0  ;;  %p852_p12 = por %p155_p8, %p41_p3 }
   0xf   : > { %s605_s8 = sshll.u32 %s762_s21, 8  ;;  %s591_s9 = sshll.u32 %s187_s7, 8 }
  0x10   : > { %s196_s12 = scalar_lea.hbm %s1147_s0, %s605_s8  ;;  %s191_s14 = scalar_lea.vmem [#allocation2], %s591_s9 }
  0x11   : > { %s197_s13 = sshll.u32 %s196_s12, 4  ;;  %s199_s15 = sshll.u32 %s191_s14, 4  ;;  %s198_s13 = int_to_ptr.hbm [resolvable:$true] %s197_s13  ;;  %s200_s15 = int_to_ptr.vmem [resolvable:$true] %s199_s15 }
  0x12   : > { %p863_p13 = pnand %p619_p10, %p837_p5  ;;  %p594_p0 = scmp.ge.s32.totalorder %s762_s21, 1 }
  0x13   : > { %p207_p1 = scmp.lt.s32.totalorder %s762_s21, 3  ;;  %s188_s17 = scalar_lea.sflag [#allocation3], %s187_s7 }
  0x14   : > { %s666_s23 = sshra.s32 %s198_s13, 4  ;;  %p670_p3 = pneg %p863_p13  ;;  %s667_s23 = int_to_ptr.hbm [resolvable:$true] %s666_s23 }
  0x15   : > { %s668_s25 = scalar_lea.hbm %s667_s23, 256  ;;  %s673_s28 = scalar_lea.hbm %s1147_s0, 512 }
  0x16   : > { %p669_p2 = scmp.ne.s32.totalorder %s667_s23, %s668_s25  ;;  %p674_p5 = scmp.lt.s32.totalorder %s667_s23, %s1147_s0 }
  0x17   : > { %p675_p8 = scmp.lt.s32.totalorder %s673_s28, %s668_s25 }
  0x18   : > { %p671_p4 = pnand %p670_p3, %p669_p2 }
  0x19   : > { %p676_p10 = por %p675_p8, %p674_p5 }
  0x1a   : > { %p672_p7 = pneg %p671_p4 }
  0x1c   : > { %p677_p9 = pnand %p676_p10, %p672_p7 }
  0x1e   : > { %680 = shalt.err (!%p677_p9)
}
  0x1f   : > { %s764_s7 = smov 1024   ;;  %s765_s11 = smov 64  }
  0x20   : > { %614 = dma.hbm_to_vmem [thread:$0]  (!%p863_p13), %s198_s13, 4096, %s200_s15, %s188_s17, %s764_s7, %s764_s7, %s765_s11  }
  0x21   : > { %p208_p2 = pnand %p594_p0, %p207_p1 }
  0x22   : > { %s884_s12 = sand.u32 (!%p208_p2), 1, %s754_s19  }
  0x23   : > { %211 = sbr.rel (%p208_p2) target bundleno = 612 (0x264), region = 40  ;;  %s595_s14 = sshll.u32 (!%p208_p2), %s884_s12, 8 }
  0x24   : > { %s214_s23 = scalar_lea.sflag (!%p208_p2), [#allocation3], %s884_s12  ;;  %s890_s25 = scalar_lea.vmem (!%p208_p2), [#allocation2], %s595_s14 }
  0x28   : > { %741 = dma.done.wait (%p841_p6), %s214_s23, 4096  }
  0x29   : > { %743 = vsyncadd (%p841_p6), %s214_s23, 4294963200  ;;  %v897_v0 = vld [vmem:[%s890_s25] sm:$0xff]  ;;  %v900_v1 = vld [vmem:[%s890_s25 + $0x8] sm:$0xff]  ;;  %vm331_vm0 = vcmask 130112   ;;  %vm335_vm1 = vcmask 195712   ;;  %vm339_vm2 = vcmask 261312  }
  0x2a   : > { %v903_v2 = vld [vmem:[%s890_s25 + $0x10] sm:$0xff]  ;;  %v277_v3 = vadd.f32 %v900_v1, %v897_v0  ;;  %v908_v4 = vld [vmem:[%s890_s25 + $0x18] sm:$0xff]  ;;  %v911_v5 = vld [vmem:[%s890_s25 + $0x80] sm:$0xff]  ;;  %vm341_vm3 = vcmask 261120   ;;  %vm367_vm4 = vcmask 64512   ;;  %s1052_s29 = scalar_lea.vmem [#allocation5], %s595_s14 }
  0x2b   : > { %v915_v7 = vld [vmem:[%s890_s25 + $0x88] sm:$0xff]  ;;  %v918_v8 = vld [vmem:[%s890_s25 + $0x90] sm:$0xff]  ;;  %v921_v9 = vld [vmem:[%s890_s25 + $0x20] sm:$0xff]  ;;  %s606_s14 = sshll.u32 %s819_s22, 8  ;;  %s512_s22 = sshll.u32 %s1052_s29, 4  ;;  %s513_s22 = int_to_ptr.vmem [resolvable:$true] %s512_s22 }
  0x2c   : > { %v278_v6 = vadd.f32 %v277_v3, %v903_v2  ;;  %v295_v10 = vadd.f32 %v915_v7, %v911_v5  ;;  %v927_v12 = vld [vmem:[%s890_s25 + $0x98] sm:$0xff]  ;;  %v930_v13 = vld [vmem:[%s890_s25 + $0x40] sm:$0xff]  ;;  %v933_v14 = vld [vmem:[%s890_s25 + $0x48] sm:$0xff]  ;;  %v326_v3 = vlaneseq  ;;  %s511_s16 = scalar_lea.hbm %s1152_s5, %s606_s14  ;;  %s500_s26 = scalar_lea.sflag [#allocation4], %s884_s12 }
  0x2d   : > { %v936_v15 = vld [vmem:[%s890_s25 + $0x28] sm:$0xff]  ;;  %v940_v17 = vld [vmem:[%s890_s25 + $0x50] sm:$0xff]  ;;  %v286_v18 = vadd.f32 %v933_v14, %v930_v13  ;;  %v949_v21 = vld [vmem:[%s890_s25 + $0xa0] sm:$0xff]  ;;  %s514_s17 = sshll.u32 %s511_s16, 4  ;;  %s716_s7 = scalar_lea.hbm %s1152_s5, 512  ;;  %s515_s17 = int_to_ptr.hbm [resolvable:$true] %s514_s17 }
  0x2e   : > { %v279_v11 = vadd.f32 %v278_v6, %v908_v4  ;;  %v296_v16 = vadd.f32 %v295_v10, %v918_v8  ;;  %v945_v19 = vld [vmem:[%s890_s25 + $0x30] sm:$0xff]  ;;  %v952_v22 = vld [vmem:[%s890_s25 + $0x58] sm:$0xff]  ;;  %v957_v25 = vld [vmem:[%s890_s25 + $0xc0] sm:$0xff]  ;;  %s710_s8 = sshra.s32 %s515_s17, 4  ;;  %s711_s8 = int_to_ptr.hbm [resolvable:$true] %s710_s8 }
  0x2f   : > { %v287_v24 = vadd.f32 %v286_v18, %v940_v17  ;;  %v960_v26 = vld [vmem:[%s890_s25 + $0xc8] sm:$0xff]  ;;  %v963_v27 = vld [vmem:[%s890_s25 + $0xd0] sm:$0xff]  ;;  %v970_v30 = vld [vmem:[%s890_s25 + $0x60] sm:$0xff]  ;;  %s712_s28 = scalar_lea.hbm %s711_s8, 256  ;;  %p717_p0 = scmp.lt.s32.totalorder %s711_s8, %s1152_s5 }
  0x30   : > { %v280_v20 = vadd.f32 %v279_v11, %v921_v9  ;;  %v297_v23 = vadd.f32 %v296_v16, %v927_v12  ;;  %v967_v29 = vld [vmem:[%s890_s25 + $0xa8] sm:$0xff]  ;;  %v304_v31 = vadd.f32 %v960_v26, %v957_v25  ;;  %v975_v32 = vld [vmem:[%s890_s25 + $0x38] sm:$0xff]  ;;  %v984_v37 = vld [vmem:[%s890_s25 + $0xb0] sm:$0xff]  ;;  %v327_v11 = vand.u32 127, %v326_v3  ;;  %p713_p6 = scmp.ne.s32.totalorder %s711_s8, %s712_s28  ;;  %p718_p1 = scmp.lt.s32.totalorder %s716_s7, %s712_s28 }
  0x31   : > { %v288_v34 = vadd.f32 %v287_v24, %v952_v22  ;;  %v980_v35 = vld [vmem:[%s890_s25 + $0xd8] sm:$0xff]  ;;  %v987_v38 = vld [vmem:[%s890_s25 + $0x68] sm:$0xff]  ;;  %v993_v42 = vld [vmem:[%s890_s25 + $0xe0] sm:$0xff] }
  0x32   : > { %v281_v28 = vadd.f32 %v280_v20, %v936_v15  ;;  %v298_v33 = vadd.f32 %v297_v23, %v949_v21  ;;  %v305_v39 = vadd.f32 %v304_v31, %v963_v27  ;;  %v997_v44 = vld [vmem:[%s890_s25 + $0xb8] sm:$0xff]  ;;  %v1000_v45 = vld [vmem:[%s890_s25 + $0x70] sm:$0xff]  ;;  %v1006_v49 = vld [vmem:[%s890_s25 + $0xe8] sm:$0xff]  ;;  %v329_v18 = vadd.s32 4294967288, %v327_v11  ;;  %p714_p9 = pnand %p713_p6, %p848_p11  ;;  %p719_p3 = por %p718_p1, %p717_p0 }
  0x33   : > { %v289_v41 = vadd.f32 %v288_v34, %v970_v30  ;;  %v1011_v52 = vld [vmem:[%s890_s25 + $0x78] sm:$0xff]  ;;  %v1015_v54 = vld [vmem:[%s890_s25 + $0xf0] sm:$0xff]  ;;  %v318_v62 = vld [vmem:[%s1148_s1 + $0x8] sm:$0xff]  ;;  %v333_v20 = vadd.s32 4294967280, %v327_v11  ;;  %v337_v31 = vadd.s32 4294967272, %v327_v11 }
  0x34   : > { %v282_v36 = vadd.f32 %v281_v28, %v945_v19  ;;  %v299_v40 = vadd.f32 %v298_v33, %v967_v29  ;;  %v306_v46 = vadd.f32 %v305_v39, %v980_v35  ;;  %v1020_v57 = vld [vmem:[%s890_s25 + $0xf8] sm:$0xff]  ;;  %v319_v61 = vld [vmem:[%s1148_s1 + $0x10] sm:$0xff]  ;;  %v317_v63 = vld [vmem:[%s1148_s1] sm:$0xff]  ;;  %p715_p13 = pneg %p714_p9 }
  0x35   : > { %v290_v48 = vadd.f32 %v289_v41, %v987_v38  ;;  %v320_v60 = vld [vmem:[%s1148_s1 + $0x18] sm:$0xff] }
  0x36   : > { %v283_v43 = vadd.f32 %v282_v36, %v975_v32  ;;  %v300_v47 = vadd.f32 %v299_v40, %v984_v37  ;;  %v307_v50 = vadd.f32 %v306_v46, %v993_v42  ;;  %356 = vmatpush.msra.mxu0 %v320_v60  ;;  %v366_v60 = vld [vmem:[%s1151_s4] sm:$0x1]  ;;  %p720_p4 = pnand %p719_p3, %p715_p13 }
  0x37   : > { %v291_v53 = vadd.f32 %v290_v48, %v1000_v45  ;;  %v365_v48 = vld [vmem:[%s1150_s3] sm:$0xff] }
  0x38   : > { %284 = vadd.xlane.f32.xlu0 %v283_v43  ;;  %v301_v51 = vadd.f32 %v300_v47, %v997_v44  ;;  %v308_v55 = vadd.f32 %v307_v50, %v1006_v49  ;;  %357 = vmatpush.msra.mxu0 %v319_v61  ;;  %v321_v50 = vld [vmem:[%s1149_s2] sm:$0x1] }
  0x39   : > { %v292_v56 = vadd.f32 %v291_v53, %v1011_v52  ;;  %386 = vmatpush.msra.mxu1 %v365_v48 }
  0x3a   : > { %302 = vadd.xlane.f32.xlu1 %v301_v51  ;;  %v309_v58 = vadd.f32 %v308_v55, %v1015_v54  ;;  %358 = vmatpush.msra.mxu0 %v318_v62 }
  0x3c   : > { %v310_v59 = vadd.f32 %v309_v58, %v1020_v57  ;;  %359 = vmatpush.msra.mxu0 %v317_v63 }
  0x40   : > { %293 = vadd.xlane.f32.xlu0 %v292_v56  ;;  %v412_v56 = vshrl.u32 %v326_v3, 7 }
  0x42   : > { %311 = vadd.xlane.f32.xlu1 %v310_v59  ;;  %657 = vset.pattern.permute.xlu2 %v412_v56  ;;  %v431_v58 = vadd.s32 24, %v412_v56  ;;  %v425_v59 = vadd.s32 16, %v412_v56 }
  0x44   : > { %660 = vset.pattern.permute.xlu1 %v431_v58  ;;  %659 = vset.pattern.permute.xlu0 %v425_v59 }
  0xab   : > { %v285_v6 = vpop.xlane.xlu0 %284 }
  0xac   : > { %v313_v16 = vmul.f32 0.0009765625, %v285_v6 }
  0xad   : > { %v303_v10 = vpop.xlane.xlu1 %302 }
  0xae   : > { %v315_v23 = vmul.f32 0.0009765625, %v303_v10  ;;  %v328_v33 = vperm.slane %v313_v16, %v327_v11 }
  0xb0   : > { %v334_v39 = vperm.slane %v315_v23, %v333_v20 }
  0xb3   : > { %v294_v24 = vpop.xlane.xlu0 %293 }
  0xb4   : > { %v314_v28 = vmul.f32 0.0009765625, %v294_v24 }
  0xb5   : > { %v312_v36 = vpop.xlane.xlu1 %311 }
  0xb6   : > { %v330_v34 = vperm.slane %v314_v28, %v329_v18  ;;  %v316_v40 = vmul.f32 0.0009765625, %v312_v36  ;;  %v419_v36 = vadd.s32 8, %v412_v56 }
  0xb8   : > { %v332_v41 = vsel %vm331_vm0, %v330_v34, %v328_v33  ;;  %v338_v43 = vperm.slane %v316_v40, %v337_v31 }
  0xb9   : > { %v336_v46 = vsel %vm335_vm1, %v334_v39, %v332_v41 }
  0xba   : > { %v340_v47 = vsel %vm339_vm2, %v338_v43, %v336_v46 }
  0xbb   : > { %597 = vmatmul.msk.f32.vlgmr.msra.gmra.mxu0 %vm341_vm3, %v340_v47 }
 0x138   : > { %v361_v51 = vpop.f32.mrf.mxu0 }
 0x139   : > { %v362_v53 = vadd.f32 %v361_v51, %v321_v50 }
 0x13b   : > { %v364_v55 = vmax.f32 %v362_v53, 0.0 }
 0x13d   : > { %598 = vmatmul.msk.f32.vlgmr.msra.gmra.mxu1 %vm367_vm4, %v364_v55 }
 0x1ba   : > { %v388_v61 = vpop.f32.mrf.mxu1 }
 0x1bb   : > { %v389_v62 = vadd.f32 %v388_v61, %v366_v60 }
 0x1bd   : > { %v599_v63 = vmul.f32 -1.442695, %v389_v62 }
 0x1bf   : > { %662 = vpow2.f32 %v599_v63 }
 0x1c5   : > { %v663_v6 = vpop.eup %662 }
 0x1c6   : > { %v394_v10 = vadd.f32 1.0, %v663_v6 }
 0x1c8   : > { %664 = vrcp.f32 %v394_v10  ;;  %v406_v3 = vand.u32 2147483648, %v394_v10  ;;  %v404_v23 = vand.u32 2147483647, %v394_v10  ;;  %vm400_vm6 = vweird.f32 %v394_v10 }
 0x1ca   : > { %v407_v28 = vor.u32 1.1754944e-38, %v406_v3  ;;  %vm405_vm8 = vcmp.eq.f32.partialorder %v404_v23, 8.507059e+37 }
 0x1ce   : > { %v665_v11 = vpop.eup %664 }
 0x1cf   : > { %v396_v16 = vmul.f32 %v665_v11, %v394_v10  ;;  %vm401_vm5 = vweird.f32 %v665_v11 }
 0x1d0   : > { %vm402_vm7 = vmor %vm400_vm6, %vm401_vm5 }
 0x1d1   : > { %v397_v18 = vsub.f32 1.0, %v396_v16 }
 0x1d3   : > { %v398_v20 = vmul.f32 %v665_v11, %v397_v18 }
 0x1d5   : > { %v399_v24 = vadd.f32 %v665_v11, %v398_v20 }
 0x1d7   : > { %v403_v31 = vsel %vm402_vm7, %v665_v11, %v399_v24 }
 0x1d8   : > { %v408_v33 = vsel %vm405_vm8, %v407_v28, %v403_v31 }
 0x1d9   : > { %v410_v34 = vperm.slane %v408_v33, 0 }
 0x1db   : > { %433 = vperm.xlu1 %660, %v410_v34   ;;  %427 = vperm.xlu0 %659, %v410_v34  }
 0x1dc   : > { %415 = vperm.xlu2 %657, %v410_v34  }
 0x1e3   : > { %661 = vset.pattern.permute.xlu0 %v431_v58 }
 0x1e4   : > { %658 = vset.pattern.permute.xlu2 %v419_v36 }
 0x1ec   : > { %421 = vperm.xlu2 %658, %v410_v34  }
 0x236   : > { %v416_v39 = vpop.permute.xlu2 %415 }
 0x237   : > { %v435_v40 = vmul.f32 %v416_v39, %v897_v0  ;;  %v436_v41 = vmul.f32 %v416_v39, %v900_v1  ;;  %v437_v43 = vmul.f32 %v416_v39, %v903_v2  ;;  %v438_v46 = vmul.f32 %v416_v39, %v908_v4 }
 0x238   : > { %v439_v47 = vmul.f32 %v416_v39, %v921_v9  ;;  %v440_v0 = vmul.f32 %v416_v39, %v936_v15  ;;  %v441_v1 = vmul.f32 %v416_v39, %v945_v19  ;;  %v442_v2 = vmul.f32 %v416_v39, %v975_v32 }
 0x239   : > { %467 = vst [vmem:[%s1052_s29] sm:$0xff] %v435_v40 }
 0x23a   : > { %468 = vst [vmem:[%s1052_s29 + $0x8] sm:$0xff] %v436_v41 }
 0x23b   : > { %469 = vst [vmem:[%s1052_s29 + $0x10] sm:$0xff] %v437_v43 }
 0x23c   : > { %470 = vst [vmem:[%s1052_s29 + $0x18] sm:$0xff] %v438_v46 }
 0x23d   : > { %471 = vst [vmem:[%s1052_s29 + $0x20] sm:$0xff] %v439_v47 }
 0x23e   : > { %472 = vst [vmem:[%s1052_s29 + $0x28] sm:$0xff] %v440_v0 }
 0x23f   : > { %473 = vst [vmem:[%s1052_s29 + $0x30] sm:$0xff] %v441_v1 }
 0x240   : > { %474 = vst [vmem:[%s1052_s29 + $0x38] sm:$0xff] %v442_v2 }
 0x246   : > { %v422_v4 = vpop.permute.xlu2 %421 }
 0x247   : > { %v443_v9 = vmul.f32 %v422_v4, %v930_v13  ;;  %v444_v15 = vmul.f32 %v422_v4, %v933_v14  ;;  %v445_v19 = vmul.f32 %v422_v4, %v940_v17  ;;  %v446_v48 = vmul.f32 %v422_v4, %v952_v22 }
 0x248   : > { %v447_v32 = vmul.f32 %v422_v4, %v970_v30  ;;  %v448_v50 = vmul.f32 %v422_v4, %v987_v38  ;;  %v449_v51 = vmul.f32 %v422_v4, %v1000_v45  ;;  %v450_v13 = vmul.f32 %v422_v4, %v1011_v52 }
 0x249   : > { %475 = vst [vmem:[%s1052_s29 + $0x40] sm:$0xff] %v443_v9 }
 0x24a   : > { %476 = vst [vmem:[%s1052_s29 + $0x48] sm:$0xff] %v444_v15 }
 0x24b   : > { %477 = vst [vmem:[%s1052_s29 + $0x50] sm:$0xff] %v445_v19 }
 0x24c   : > { %478 = vst [vmem:[%s1052_s29 + $0x58] sm:$0xff] %v446_v48 }
 0x24d   : > { %479 = vst [vmem:[%s1052_s29 + $0x60] sm:$0xff] %v447_v32  ;;  %v434_v14 = vpop.permute.xlu1 %433  ;;  %v428_v53 = vpop.permute.xlu0 %427 }
 0x24e   : > { %480 = vst [vmem:[%s1052_s29 + $0x68] sm:$0xff] %v448_v50  ;;  %v459_v17 = vmul.f32 %v434_v14, %v957_v25  ;;  %v460_v22 = vmul.f32 %v434_v14, %v960_v26  ;;  %v461_v30 = vmul.f32 %v434_v14, %v963_v27  ;;  %v462_v38 = vmul.f32 %v434_v14, %v980_v35 }
 0x24f   : > { %481 = vst [vmem:[%s1052_s29 + $0x70] sm:$0xff] %v449_v51  ;;  %v463_v45 = vmul.f32 %v434_v14, %v993_v42  ;;  %v464_v52 = vmul.f32 %v434_v14, %v1006_v49  ;;  %v465_v25 = vmul.f32 %v434_v14, %v1015_v54  ;;  %v466_v26 = vmul.f32 %v434_v14, %v1020_v57 }
 0x250   : > { %482 = vst [vmem:[%s1052_s29 + $0x78] sm:$0xff] %v450_v13  ;;  %v451_v27 = vmul.f32 %v428_v53, %v911_v5  ;;  %v452_v35 = vmul.f32 %v428_v53, %v915_v7  ;;  %v453_v42 = vmul.f32 %v428_v53, %v918_v8  ;;  %v454_v49 = vmul.f32 %v428_v53, %v927_v12 }
 0x251   : > { %491 = vst [vmem:[%s1052_s29 + $0xc0] sm:$0xff] %v459_v17  ;;  %v455_v5 = vmul.f32 %v428_v53, %v949_v21  ;;  %v456_v7 = vmul.f32 %v428_v53, %v967_v29  ;;  %v457_v8 = vmul.f32 %v428_v53, %v984_v37  ;;  %v458_v54 = vmul.f32 %v428_v53, %v997_v44 }
 0x252   : > { %492 = vst [vmem:[%s1052_s29 + $0xc8] sm:$0xff] %v460_v22 }
 0x253   : > { %493 = vst [vmem:[%s1052_s29 + $0xd0] sm:$0xff] %v461_v30 }
 0x254   : > { %494 = vst [vmem:[%s1052_s29 + $0xd8] sm:$0xff] %v462_v38 }
 0x255   : > { %495 = vst [vmem:[%s1052_s29 + $0xe0] sm:$0xff] %v463_v45 }
 0x256   : > { %496 = vst [vmem:[%s1052_s29 + $0xe8] sm:$0xff] %v464_v52 }
 0x257   : > { %497 = vst [vmem:[%s1052_s29 + $0xf0] sm:$0xff] %v465_v25 }
 0x258   : > { %498 = vst [vmem:[%s1052_s29 + $0xf8] sm:$0xff] %v466_v26 }
 0x259   : > { %483 = vst [vmem:[%s1052_s29 + $0x80] sm:$0xff] %v451_v27 }
 0x25a   : > { %484 = vst [vmem:[%s1052_s29 + $0x88] sm:$0xff] %v452_v35 }
 0x25b   : > { %485 = vst [vmem:[%s1052_s29 + $0x90] sm:$0xff] %v453_v42 }
 0x25c   : > { %486 = vst [vmem:[%s1052_s29 + $0x98] sm:$0xff] %v454_v49 }
 0x25d   : > { %487 = vst [vmem:[%s1052_s29 + $0xa0] sm:$0xff] %v455_v5 }
 0x25e   : > { %488 = vst [vmem:[%s1052_s29 + $0xa8] sm:$0xff] %v456_v7 }
 0x25f   : > { %489 = vst [vmem:[%s1052_s29 + $0xb0] sm:$0xff] %v457_v8 }
 0x260   : > { %490 = vst [vmem:[%s1052_s29 + $0xb8] sm:$0xff] %v458_v54 }
 0x261   : > { %723 = shalt.err (!%p720_p4)
}
 0x262   : > { %s766_s12 = smov 1024   ;;  %s767_s25 = smov 64  }
 0x263   : > { %609 = dma.vmem_to_hbm [thread:$0]  (%p848_p11), %s513_s22, 4096, %s515_s17, %s500_s26, %s766_s12, %s766_s12, %s767_s25  }
 0x264 PF: > { %s529_s29 = sand.u32 1, %s750_s18   ;;  %p1158_p7 = scmp.ge.s32.totalorder %s762_s21, 2 }
 0x265   : > { %s530_s14 = scalar_lea.sflag [#allocation4], %s529_s29 }
 0x266   : > { %p616_p5 = pnand %p1158_p7, %p852_p12 }
 0x268   : > { %p617_p8 = pneg %p616_p5 }
 0x26a   : > { %745 = dma.done.wait (%p617_p8), %s530_s14, 4096  }
 0x26b   : > { %747 = vsyncadd (%p617_p8), %s530_s14, 4294963200  ;;  %p18_p10 = scmp.ge.s32.totalorder %s823_s24, 4   ;;  %s1159_s18 = smov %s754_s19 }
 0x26c   : > { %s1160_s19 = smov %s758_s20  ;;  %s1161_s20 = smov %s835_s27 }
 0x26d   : > { %s1162_s21 = smov %s823_s24  ;;  %20 = sbr.rel (!%p18_p10) target bundleno = 5 (0x5), region = 85 }
 0x272   :  { %536 = vsyncpa [#allocation3], 1 }
 0x273   :  { %538 = vsyncpa [#allocation3 + $0x1], 1 }
 0x274   :  { %539 = vsyncpa [#allocation4], 1 }
 0x275   :  { %541 = vsyncpa [#allocation4 + $0x1], 1 }

</bundles_post_ra>
